<compile_context>
chip_gen: v7x
topology: tpu7x:2x2x1
jax: 0.10.0
libtpu: 0.0.40
codegen_flags: <defaults>
</compile_context>

<pallas_src>
import jax
import jax.numpy as jnp
from jax.experimental import pallas as pl
from jax.experimental.pallas import tpu as pltpu


def _attention_kernel(x_ref, w_ref, b_ref, o_ref):
    # x_ref: (TB, S, D) VMEM   w_ref: (1, D) VMEM   b_ref: (1, 1) SMEM
    # o_ref: (TB, D) VMEM
    x = x_ref[...].astype(jnp.float32)          # (TB, S, D)
    w = w_ref[...].astype(jnp.float32)          # (1, D)
    b = b_ref[0, 0]                             # scalar from SMEM

    # scores = x @ W.T + b  -> (TB, S); lane (last-dim) reduce on the VPU/XLU.
    scores = jnp.sum(x * w, axis=-1) + b        # (TB, S)

    # Numerically-stable, *exact* softmax over the sequence axis
    # (PyTorch dim=0, applied independently per sequence).
    m = jnp.max(scores, axis=-1, keepdims=True)            # (TB, 1)
    e = jnp.exp(scores - m)                                 # (TB, S)
    denom = jnp.sum(e, axis=-1, keepdims=True)              # (TB, 1)
    alpha = e / denom                                       # exact divide

    # Weighted sum over the sequence on the VPU + XLU sublane reduce.
    # (M=1 per sequence makes the MXU pure latency; keep it off the MXU.)
    out = jnp.sum(x * alpha[:, :, None], axis=1)            # (TB, D)
    o_ref[...] = out.astype(o_ref.dtype)


def _round_up(n, m):
    return ((n + m - 1) // m) * m


def _pick_batch_block(batch, seq, dim, itemsize):
    """VMEM-aware batch block: biggest tile that keeps the pipeline cheap."""
    try:
        vmem_cap = int(pltpu.get_tpu_info().vmem_capacity_bytes)
    except Exception:
        vmem_cap = 64 << 20  # conservative: v7x per-TensorCore VMEM
    # Target a few MiB for the x block; leave headroom for double-buffering,
    # the f32 temporaries inside the kernel body, and the output block.
    x_block_budget = min(4 << 20, vmem_cap // 32)
    tb = max(8, (x_block_budget // max(1, seq * dim * itemsize)) // 8 * 8)
    tb = min(tb, _round_up(batch, 8))  # tiny B -> single grid step
    return tb, vmem_cap


def attention_batched(x, weight, bias, *, batch_block=None):
    """Apply AttentionModule.forward independently to each sequence.

    x: (B, S, D), weight: (1, D), bias: (1,)  ->  (B, D)
    """
    B, S, D = x.shape
    itemsize = jnp.dtype(x.dtype).itemsize
    if batch_block is None:
        tb, vmem_cap = _pick_batch_block(B, S, D, itemsize)
    else:
        tb, vmem_cap = batch_block, 64 << 20

    b_pad = _round_up(B, tb)
    if b_pad != B:
        # Zero-padded dummy sequences: softmax of constant scores is uniform,
        # weighted sum of zeros is zero -> numerically safe, sliced off below.
        x = jnp.pad(x, ((0, b_pad - B), (0, 0), (0, 0)))

    bias_smem = bias.reshape(1, 1).astype(jnp.float32)

    # Double-buffered footprint (x in + out) with headroom; keep the explicit
    # limit well under every generation's physical VMEM.
    needed = 2 * (tb * S * D * itemsize) + 2 * (tb * D * itemsize) + D * 4 + (1 << 20)
    vmem_limit = int(min(max(2 * needed, 16 << 20), vmem_cap // 2))

    out = pl.pallas_call(
        _attention_kernel,
        out_shape=jax.ShapeDtypeStruct((b_pad, D), x.dtype),
        grid_spec=pltpu.PrefetchScalarGridSpec(
            num_scalar_prefetch=0,
            grid=(b_pad // tb,),
            in_specs=[
                # Batch-blocked activations; (S, D) are full-extent dims.
                pl.BlockSpec((tb, S, D), lambda i: (i, 0, 0)),
                # Weight: single block, constant index_map (fetched once).
                pl.BlockSpec((1, D), lambda i: (0, 0)),
                # Bias scalar lives in SMEM.
                pl.BlockSpec(memory_space=pltpu.MemorySpace.SMEM),
            ],
            out_specs=pl.BlockSpec((tb, D), lambda i: (i, 0)),
        ),
        compiler_params=pltpu.CompilerParams(
            dimension_semantics=("parallel",),   # shard batch across TCs (v7x)
            vmem_limit_bytes=vmem_limit,
        ),
    )(x, weight, bias_smem)
    return out[:B]


def attention_module(x, weight, bias):
    """Exact PyTorch AttentionModule.forward: x (S, D) -> (D,)."""
    return attention_batched(x[None], weight, bias)[0]


if __name__ == "__main__":
    S, D = 8, 32     # seq=8, feature_dim=32
    B = 16           # batch of independent sequences

    key = jax.random.PRNGKey(0)
    kx, kw, kb = jax.random.split(key, 3)
    xb = jax.random.normal(kx, (B, S, D), dtype=jnp.float32)
    # Deterministic "Linear(feature_dim, 1)" parameters (synthetic init).
    weight = jax.random.normal(kw, (1, D), dtype=jnp.float32) * 0.1
    bias = jax.random.normal(kb, (1,), dtype=jnp.float32) * 0.1

    # Batched path (one pallas_call for all B sequences).
    out_b = jax.block_until_ready(attention_batched(xb, weight, bias))

    # Single-sequence path == the PyTorch module forward on (S, D).
    out_1 = jax.block_until_ready(attention_module(xb[0], weight, bias))

    # Plain-JAX reference mirroring the PyTorch forward per sequence.
    # (Elementwise multiply + sum so the reference itself isn't subject to
    # TPU default-precision matmul rounding.)
    scores_ref = jnp.sum(xb * weight[0], axis=-1, keepdims=True) + bias  # (B, S, 1)
    alpha_ref = jax.nn.softmax(scores_ref, axis=1)
    ref_b = jnp.sum(xb * alpha_ref, axis=1)                              # (B, D)

    assert out_b.shape == (B, D)
    assert out_1.shape == (D,)
    assert jnp.allclose(out_b, ref_b, atol=1e-4, rtol=1e-4)
    assert jnp.allclose(out_1, ref_b[0], atol=1e-4, rtol=1e-4)
    print("KERNEL_OK")
</pallas_src>

<mosaic_0001>
module attributes {stable_mosaic.version = 11 : i64} {
  func.func @_attention_kernel(%arg0: i32, %arg1: memref<16x8x32xf32, #tpu.memory_space<vmem>>, %arg2: memref<1x32xf32, #tpu.memory_space<vmem>>, %arg3: memref<1x1xf32, #tpu.memory_space<smem>>, %arg4: memref<16x32xf32, #tpu.memory_space<vmem>>) attributes {dimension_semantics = [#tpu.dimension_semantics<parallel>], iteration_bounds = array<i64: 1>, scalar_prefetch = 0 : i64, scratch_operands = 0 : i64, tpu.core_type = #tpu.core_type<tc>, window_params = [{transform_indices = @transform_0, window_bounds = array<i64: 16, 8, 32>}, {pipeline_mode = #tpu.pipeline_mode<synchronous>, transform_indices = @transform_1, window_bounds = array<i64: 1, 32>}, {transform_indices = @transform_2, window_bounds = array<i64: 1, 1>}, {transform_indices = @transform_3, window_bounds = array<i64: 16, 32>}]} {
    %c0 = arith.constant 0 : index
    %c0_0 = arith.constant 0 : index
    %c0_1 = arith.constant 0 : index
    %0 = vector.load %arg1[%c0, %c0_0, %c0_1] : memref<16x8x32xf32, #tpu.memory_space<vmem>>, vector<16x8x32xf32>
    %c0_2 = arith.constant 0 : index
    %c0_3 = arith.constant 0 : index
    %1 = vector.load %arg2[%c0_2, %c0_3] : memref<1x32xf32, #tpu.memory_space<vmem>>, vector<1x32xf32>
    %c0_4 = arith.constant 0 : index
    %c0_5 = arith.constant 0 : index
    %2 = memref.load %arg3[%c0_4, %c0_5] : memref<1x1xf32, #tpu.memory_space<smem>>
    %3 = vector.shape_cast %1 : vector<1x32xf32> to vector<1x1x32xf32>
    %4 = vector.broadcast %3 : vector<1x1x32xf32> to vector<16x8x32xf32>
    %5 = arith.mulf %0, %4 : vector<16x8x32xf32>
    %cst = arith.constant dense<0.000000e+00> : vector<16x8xf32>
    %6 = vector.multi_reduction <add>, %5, %cst [2] : vector<16x8x32xf32> to vector<16x8xf32>
    %7 = vector.broadcast %2 : f32 to vector<16x8xf32>
    %8 = arith.addf %6, %7 : vector<16x8xf32>
    %cst_6 = arith.constant dense<0xFF800000> : vector<16xf32>
    %9 = vector.multi_reduction <maximumf>, %8, %cst_6 [1] : vector<16x8xf32> to vector<16xf32>
    %10 = vector.shape_cast %9 : vector<16xf32> to vector<16x1xf32>
    %11 = vector.broadcast %10 : vector<16x1xf32> to vector<16x8xf32>
    %12 = arith.subf %8, %11 : vector<16x8xf32>
    %13 = math.exp %12 : vector<16x8xf32>
    %cst_7 = arith.constant dense<0.000000e+00> : vector<16xf32>
    %14 = vector.multi_reduction <add>, %13, %cst_7 [1] : vector<16x8xf32> to vector<16xf32>
    %15 = vector.shape_cast %14 : vector<16xf32> to vector<16x1xf32>
    %16 = vector.broadcast %15 : vector<16x1xf32> to vector<16x8xf32>
    %17 = arith.divf %13, %16 : vector<16x8xf32>
    %18 = vector.shape_cast %17 : vector<16x8xf32> to vector<16x8x1xf32>
    %19 = vector.broadcast %18 : vector<16x8x1xf32> to vector<16x8x32xf32>
    %20 = arith.mulf %0, %19 : vector<16x8x32xf32>
    %cst_8 = arith.constant dense<0.000000e+00> : vector<16x32xf32>
    %21 = vector.multi_reduction <add>, %20, %cst_8 [1] : vector<16x8x32xf32> to vector<16x32xf32>
    %c0_9 = arith.constant 0 : index
    %c0_10 = arith.constant 0 : index
    %22 = vector.load %arg4[%c0_9, %c0_10] : memref<16x32xf32, #tpu.memory_space<vmem>>, vector<16x32xf32>
    tpu.vector_store %arg4[%c0_9, %c0_10], %21 {strides = array<i32>} : memref<16x32xf32, #tpu.memory_space<vmem>>, vector<16x32xf32>,
    return
  }
  func.func @transform_0(%arg0: i32) -> (i32, i32, i32) {
    %c0_i32 = arith.constant 0 : i32
    %c0_i32_0 = arith.constant 0 : i32
    %c0_i32_1 = arith.constant 0 : i32
    return %arg0, %c0_i32, %c0_i32_0 : i32, i32, i32
  }
  func.func @transform_1(%arg0: i32) -> (i32, i32) {
    %c0_i32 = arith.constant 0 : i32
    %c0_i32_0 = arith.constant 0 : i32
    %c0_i32_1 = arith.constant 0 : i32
    return %c0_i32, %c0_i32_0 : i32, i32
  }
  func.func @transform_2(%arg0: i32) -> (i32, i32) {
    %c0_i32 = arith.constant 0 : i32
    %c0_i32_0 = arith.constant 0 : i32
    %c0_i32_1 = arith.constant 0 : i32
    return %c0_i32, %c0_i32_0 : i32, i32
  }
  func.func @transform_3(%arg0: i32) -> (i32, i32) {
    %c0_i32 = arith.constant 0 : i32
    %c0_i32_0 = arith.constant 0 : i32
    return %arg0, %c0_i32 : i32, i32
  }
}

</mosaic_0001>

<bundles_post_ra>
// kernel: tpu_custom_call.1
= control target key start
LH: loop header
LB: loop body
LE: loop exit
PB: predicated region body
PF: predicated region fallthrough
CT: control target
= control target key end

     0   :  { %9 = vsyncpa [#allocation4], 0  ;;  %s1456_s0 = inlined_call_operand.hbm [shape: f32[16,8,32], index: 0, kind: input, shape index: {}]   ;;  %s1457_s1 = inlined_call_operand.vmem [shape: f32[1,32], index: 1, kind: input, shape index: {}]   ;;  %s1458_s2 = inlined_call_operand.<no memory space> [shape: f32[1,1], index: 2, kind: input, shape index: {}]   ;;  %s1459_s3 = inlined_call_operand.hbm [shape: f32[16,32], index: 3, kind: output, shape index: {}]  }
   0x1   :  { %10 = vsyncpa [#allocation5], 0  ;;  %s1021_s12 = smov [#allocation3]   ;;  %s973_s16 = scalar_lea.hbm %s1456_s0, 2048 }
   0x2   :  { %s16_s13 = sshll.u32 %s1021_s12, 4  ;;  %p974_p0 = scmp.ne.s32.totalorder %s1456_s0, %s973_s16  ;;  %s17_s13 = int_to_ptr.vmem [resolvable:$true] %s16_s13 }
   0x3   :  { %p977_p1 = scmp.lt.u32.totalorder %s973_s16, %s1456_s0 }
   0x5   :  { %p979_p2 = pnand %p977_p1, %p974_p0 }
   0x7   :  { %982 = shalt.err (!%p979_p2)
}
   0x8   :  { %s983_s21 = scalar_lea.vmem %s17_s13, 2048  ;;  %p988_p4 = scmp.lt.s32.totalorder %s17_s13, %s17_s13 }
   0x9   :  { %p984_p3 = scmp.ne.s32.totalorder %s17_s13, %s983_s21  ;;  %p989_p5 = scmp.lt.s32.totalorder %s983_s21, %s983_s21 }
   0xb   :  { %p990_p6 = por %p989_p5, %p988_p4 }
   0xd   :  { %p991_p7 = pnand %p990_p6, %p984_p3 }
   0xf   :  { %994 = shalt.err (!%p991_p7)
}
  0x10   :  { %s1022_s22 = smov 128   ;;  %s1023_s23 = smov 8  }
  0x11   :  { %22 = dma.hbm_to_vmem [thread:$0]  %s1456_s0, 2048, %s17_s13, [#allocation4], %s1022_s22, %s1022_s22, %s1023_s23  }
  0x12   :  { %1017 = dma.done.wait [#allocation4], 2048  }
  0x13   :  { %1018 = vsyncadd [#allocation4], 4294965248  ;;  %v1061_v0 = vld [vmem:[#allocation3 + $0x40] sm:$0xff]  ;;  %vm70_vm0 = vcmask 261120   ;;  %v1070_v5 = vld [vmem:[#allocation3 + $0x48] sm:$0xff]  ;;  %v152_v55 = vlaneseq  ;;  %v119_v62 = vstv %s1458_s2  ;;  %vm218_vm1 = vcmask 1041409  }
  0x14   :  { %v901_v1 = vld [vmem:[%s1457_s1] ss:$0 sm:$0xff]  ;;  %v1072_v6 = vld [vmem:[#allocation3 + $0x8] sm:$0xff]  ;;  %v1076_v9 = vld [vmem:[#allocation3 + $0x50] sm:$0xff]  ;;  %vm220_vm2 = vcmask 1042434   ;;  %vm222_vm3 = vcmask 1043459  }
  0x15   :  { %v1066_v2 = vld [vmem:[#allocation3] sm:$0xff]  ;;  %v62_v3 = vmul.f32 %v901_v1, %v1061_v0  ;;  %v63_v7 = vmul.f32 %v901_v1, %v1070_v5  ;;  %v55_v8 = vmul.f32 %v901_v1, %v1072_v6  ;;  %v1078_v10 = vld [vmem:[#allocation3 + $0x10] sm:$0xff]  ;;  %v64_v15 = vmul.f32 %v901_v1, %v1076_v9  ;;  %v1086_v17 = vld [vmem:[#allocation3 + $0x58] sm:$0xff]  ;;  %s1025_s2 = smov [#allocation6]  }
  0x16   :  { %v54_v4 = vmul.f32 %v901_v1, %v1066_v2  ;;  %v56_v16 = vmul.f32 %v901_v1, %v1078_v10  ;;  %v1088_v18 = vld [vmem:[#allocation3 + $0x18] sm:$0xff]  ;;  %v65_v21 = vmul.f32 %v901_v1, %v1086_v17  ;;  %v1094_v23 = vld [vmem:[#allocation3 + $0x60] sm:$0xff]  ;;  %v1102_v29 = vld [vmem:[#allocation3 + $0x68] sm:$0xff]  ;;  %v153_v58 = vand.u32 127, %v152_v55  ;;  %s889_s28 = sshll.u32 %s1025_s2, 4  ;;  %s890_s28 = int_to_ptr.vmem [resolvable:$true] %s889_s28 }
  0x17   :  { %v95_v11 = vsel %vm70_vm0, %v62_v3, 0.0  ;;  %v98_v13 = vsel %vm70_vm0, %v63_v7, 0.0  ;;  %v74_v14 = vsel %vm70_vm0, %v55_v8, 0.0  ;;  %v101_v19 = vsel %vm70_vm0, %v64_v15, 0.0  ;;  %v1096_v24 = vld [vmem:[#allocation3 + $0x20] sm:$0xff]  ;;  %v1104_v30 = vld [vmem:[#allocation3 + $0x28] sm:$0xff]  ;;  %p1000_p9 = scmp.lt.s32.totalorder %s890_s28, %s890_s28 }
  0x18   :  { %v71_v12 = vsel %vm70_vm0, %v54_v4, 0.0  ;;  %96 = vadd.xlane.f32.xlu1 %v95_v11  ;;  %v77_v20 = vsel %vm70_vm0, %v56_v16, 0.0  ;;  %v57_v22 = vmul.f32 %v901_v1, %v1088_v18  ;;  %v104_v25 = vsel %vm70_vm0, %v65_v21, 0.0  ;;  %v1110_v35 = vld [vmem:[#allocation3 + $0x70] sm:$0xff]  ;;  %v1118_v41 = vld [vmem:[#allocation3 + $0x78] sm:$0xff]  ;;  %s995_s29 = scalar_lea.vmem %s890_s28, 256 }
  0x19   :  { %72 = vadd.xlane.f32.xlu0 %v71_v12  ;;  %v66_v27 = vmul.f32 %v901_v1, %v1094_v23  ;;  %v58_v28 = vmul.f32 %v901_v1, %v1096_v24  ;;  %v67_v33 = vmul.f32 %v901_v1, %v1102_v29  ;;  %v59_v34 = vmul.f32 %v901_v1, %v1104_v30  ;;  %v1112_v36 = vld [vmem:[#allocation3 + $0x30] sm:$0xff]  ;;  %v1120_v42 = vld [vmem:[#allocation3 + $0x38] sm:$0xff]  ;;  %p996_p8 = scmp.ne.s32.totalorder %s890_s28, %s995_s29  ;;  %p1001_p10 = scmp.lt.s32.totalorder %s995_s29, %s995_s29 }
  0x1a   :  { %v80_v26 = vsel %vm70_vm0, %v57_v22, 0.0  ;;  %v68_v39 = vmul.f32 %v901_v1, %v1110_v35  ;;  %v60_v40 = vmul.f32 %v901_v1, %v1112_v36  ;;  %v69_v45 = vmul.f32 %v901_v1, %v1118_v41 }
  0x1b   :  { %v107_v31 = vsel %vm70_vm0, %v66_v27, 0.0  ;;  %v83_v32 = vsel %vm70_vm0, %v58_v28, 0.0  ;;  %v110_v37 = vsel %vm70_vm0, %v67_v33, 0.0  ;;  %v86_v38 = vsel %vm70_vm0, %v59_v34, 0.0  ;;  %p1002_p11 = por %p1001_p10, %p1000_p9 }
  0x1c   :  { %99 = vadd.xlane.f32.xlu1 %v98_v13  ;;  %v113_v43 = vsel %vm70_vm0, %v68_v39, 0.0  ;;  %v89_v44 = vsel %vm70_vm0, %v60_v40, 0.0  ;;  %v61_v46 = vmul.f32 %v901_v1, %v1120_v42  ;;  %v116_v47 = vsel %vm70_vm0, %v69_v45, 0.0 }
  0x1d   :  { %75 = vadd.xlane.f32.xlu0 %v74_v14  ;;  %v1128_v59 = vshrl.u32 %v152_v55, 7  ;;  %vm224_vm4 = vcmask 1044484   ;;  %vm226_vm5 = vcmask 1045509   ;;  %vm228_vm6 = vcmask 1046534   ;;  %p1003_p12 = pnand %p1002_p11, %p996_p8 }
  0x1e   :  { %v92_v48 = vsel %vm70_vm0, %v61_v46, 0.0  ;;  %vm230_vm7 = vcmask 1047559   ;;  %vm241_vm8 = vcmask 64512  }
  0x1f   :  { %v1140_v4 = vsub.s32 %v153_v58, %v1128_v59 }
  0x20   :  { %102 = vadd.xlane.f32.xlu1 %v101_v19 }
  0x21   :  { %78 = vadd.xlane.f32.xlu0 %v77_v20 }
  0x24   :  { %105 = vadd.xlane.f32.xlu1 %v104_v25 }
  0x25   :  { %81 = vadd.xlane.f32.xlu0 %v80_v26 }
  0x28   :  { %108 = vadd.xlane.f32.xlu1 %v107_v31 }
  0x29   :  { %84 = vadd.xlane.f32.xlu0 %v83_v32 }
  0x2c   :  { %111 = vadd.xlane.f32.xlu1 %v110_v37 }
  0x2d   :  { %87 = vadd.xlane.f32.xlu0 %v86_v38 }
  0x30   :  { %114 = vadd.xlane.f32.xlu1 %v113_v43 }
  0x31   :  { %90 = vadd.xlane.f32.xlu0 %v89_v44 }
  0x34   :  { %117 = vadd.xlane.f32.xlu1 %v116_v47 }
  0x35   :  { %93 = vadd.xlane.f32.xlu0 %v92_v48 }
  0xa5   :  { %v97_v49 = vpop.xlane.xlu1 %96 }
  0xa6   :  { %v73_v50 = vpop.xlane.xlu0 %72  ;;  %v1133_v63 = vadd.f32 %v119_v62, %v97_v49 }
  0xa7   :  { %v1142_v7 = vadd.f32 %v119_v62, %v73_v50 }
  0xa8   :  { %v189_v16 = vrot.slane %v1133_v63, %v1140_v4 }
  0xa9   :  { %v100_v51 = vpop.xlane.xlu1 %99  ;;  %v157_v27 = vrot.slane %v1142_v7, %v1140_v4 }
  0xaa   :  { %v76_v52 = vpop.xlane.xlu0 %75  ;;  %v1135_v1 = vadd.f32 %v119_v62, %v100_v51 }
  0xab   :  { %v1137_v3 = vadd.f32 %v119_v62, %v76_v52 }
  0xac   :  { %v193_v21 = vrot.slane %v1135_v1, %v1140_v4 }
  0xad   :  { %v103_v53 = vpop.xlane.xlu1 %102  ;;  %v161_v22 = vrot.slane %v1137_v3, %v1140_v4 }
  0xae   :  { %v79_v54 = vpop.xlane.xlu0 %78  ;;  %v1144_v8 = vadd.f32 %v119_v62, %v103_v53  ;;  %v232_v44 = vsel %vm218_vm1, %v193_v21, %v189_v16 }
  0xaf   :  { %v1146_v11 = vadd.f32 %v119_v62, %v79_v54  ;;  %v219_v45 = vsel %vm218_vm1, %v161_v22, %v157_v27 }
  0xb0   :  { %v197_v28 = vrot.slane %v1144_v8, %v1140_v4 }
  0xb1   :  { %v106_v56 = vpop.xlane.xlu1 %105  ;;  %v165_v31 = vrot.slane %v1146_v11, %v1140_v4 }
  0xb2   :  { %v82_v57 = vpop.xlane.xlu0 %81  ;;  %v1148_v14 = vadd.f32 %v119_v62, %v106_v56  ;;  %v233_v48 = vsel %vm220_vm2, %v197_v28, %v232_v44 }
  0xb3   :  { %v1150_v15 = vadd.f32 %v119_v62, %v82_v57  ;;  %v221_v49 = vsel %vm220_vm2, %v165_v31, %v219_v45 }
  0xb4   :  { %v201_v34 = vrot.slane %v1148_v14, %v1140_v4 }
  0xb5   :  { %v109_v60 = vpop.xlane.xlu1 %108  ;;  %v169_v37 = vrot.slane %v1150_v15, %v1140_v4 }
  0xb6   :  { %v85_v61 = vpop.xlane.xlu0 %84  ;;  %v1154_v19 = vadd.f32 %v119_v62, %v109_v60  ;;  %v234_v54 = vsel %vm222_vm3, %v201_v34, %v233_v48  ;;  %v1217_v34 = vsub.s32 1, %v1128_v59 }
  0xb7   :  { %v1156_v20 = vadd.f32 %v119_v62, %v85_v61  ;;  %v223_v55 = vsel %vm222_vm3, %v169_v37, %v221_v49 }
  0xb8   :  { %v205_v40 = vrot.slane %v1154_v19, %v1140_v4 }
  0xb9   :  { %v112_v12 = vpop.xlane.xlu1 %111  ;;  %v173_v43 = vrot.slane %v1156_v20, %v1140_v4 }
  0xba   :  { %v88_v13 = vpop.xlane.xlu0 %87  ;;  %v1162_v25 = vadd.f32 %v119_v62, %v112_v12  ;;  %v235_v58 = vsel %vm224_vm4, %v205_v40, %v234_v54  ;;  %v1222_v40 = vsub.s32 4, %v1128_v59 }
  0xbb   :  { %v1164_v26 = vadd.f32 %v119_v62, %v88_v13  ;;  %v225_v60 = vsel %vm224_vm4, %v173_v43, %v223_v55 }
  0xbc   :  { %v209_v46 = vrot.slane %v1162_v25, %v1140_v4 }
  0xbd   :  { %v115_v32 = vpop.xlane.xlu1 %114  ;;  %v177_v47 = vrot.slane %v1164_v26, %v1140_v4 }
  0xbe   :  { %v91_v33 = vpop.xlane.xlu0 %90  ;;  %v1176_v38 = vadd.f32 %v119_v62, %v115_v32  ;;  %v236_v13 = vsel %vm226_vm5, %v209_v46, %v235_v58  ;;  %v1024_v32 = vmov 0   ;;  %v1229_v46 = vsub.s32 5, %v1128_v59 }
  0xbf   :  { %v1178_v39 = vadd.f32 %v119_v62, %v91_v33  ;;  %v227_v16 = vsel %vm226_vm5, %v177_v47, %v225_v60  ;;  %908 = vset.pattern.permute.xlu1 %v1024_v32  ;;  %907 = vset.pattern.permute.xlu0 %v1024_v32  ;;  %v1214_v33 = vsub.s32 0, %v1128_v59 }
  0xc0   :  { %v213_v50 = vrot.slane %v1176_v38, %v1140_v4 }
  0xc1   :  { %v181_v51 = vrot.slane %v1178_v39, %v1140_v4  ;;  %v118_v52 = vpop.xlane.xlu1 %117 }
  0xc2   :  { %v94_v53 = vpop.xlane.xlu0 %93  ;;  %v135_v56 = vadd.f32 %v119_v62, %v118_v52  ;;  %v237_v21 = vsel %vm228_vm6, %v213_v50, %v236_v13  ;;  %v1239_v52 = vsub.s32 6, %v1128_v59 }
  0xc3   :  { %v1198_v57 = vadd.f32 %v119_v62, %v94_v53  ;;  %v229_v62 = vsel %vm228_vm6, %v181_v51, %v227_v16  ;;  %v1236_v51 = vsub.s32 2, %v1128_v59 }
  0xc4   :  { %v217_v61 = vrot.slane %v135_v56, %v1140_v4 }
  0xc5   :  { %v185_v12 = vrot.slane %v1198_v57, %v1140_v4 }
  0xc6   :  { %v238_v22 = vsel %vm230_vm7, %v217_v61, %v237_v21 }
  0xc7   :  { %v231_v27 = vsel %vm230_vm7, %v185_v12, %v229_v62  ;;  %v245_v28 = vsel %vm241_vm8, %v238_v22, -inf }
  0xc8   :  { %v242_v31 = vsel %vm241_vm8, %v231_v27, -inf  ;;  %246 = vmax.xlane.f32.xlu1 %v245_v28 }
  0xc9   :  { %243 = vmax.xlane.f32.xlu0 %v242_v31 }
 0x155   :  { %v247_v43 = vpop.xlane.xlu1 %246 }
 0x156   :  { %v1219_v37 = vpop.xlane.xlu0 %243  ;;  %v301_v47 = vrot.slane %v247_v43, %v1222_v40  ;;  %v285_v48 = vrot.slane %v247_v43, %v1214_v33  ;;  %v305_v53 = vrot.slane %v247_v43, %v1229_v46  ;;  %v289_v55 = vrot.slane %v247_v43, %v1217_v34 }
 0x157   :  { %v253_v44 = vrot.slane %v1219_v37, %v1214_v33  ;;  %v257_v45 = vrot.slane %v1219_v37, %v1217_v34 }
 0x158   :  { %v342_v54 = vsub.f32 %v1154_v19, %v301_v47  ;;  %v338_v58 = vsub.f32 %v1133_v63, %v285_v48  ;;  %v343_v12 = vsub.f32 %v1162_v25, %v305_v53  ;;  %v339_v16 = vsub.f32 %v1135_v1, %v289_v55 }
 0x159   :  { %v330_v49 = vsub.f32 %v1142_v7, %v253_v44  ;;  %v331_v50 = vsub.f32 %v1137_v3, %v257_v45  ;;  %v1246_v7 = vsub.s32 7, %v1128_v59  ;;  %v309_v3 = vrot.slane %v247_v43, %v1239_v52 }
 0x15a   :  { %v370_v13 = vmul.f32 1.442695, %v342_v54  ;;  %v362_v21 = vmul.f32 1.442695, %v338_v58  ;;  %v261_v19 = vrot.slane %v1219_v37, %v1236_v51  ;;  %v1254_v63 = vsub.s32 3, %v1128_v59 }
 0x15b   :  { %v346_v60 = vmul.f32 1.442695, %v330_v49  ;;  %v348_v61 = vmul.f32 1.442695, %v331_v50  ;;  %v313_v62 = vrot.slane %v247_v43, %v1246_v7  ;;  %v344_v22 = vsub.f32 %v1176_v38, %v309_v3 }
 0x15c   :  { %v372_v27 = vmul.f32 1.442695, %v343_v12  ;;  %v293_v25 = vrot.slane %v247_v43, %v1236_v51  ;;  %v364_v28 = vmul.f32 1.442695, %v339_v16  ;;  %v332_v1 = vsub.f32 %v1146_v11, %v261_v19 }
 0x15d   :  { %909 = vpow2.f32 %v346_v60  ;;  %v345_v31 = vsub.f32 %v135_v56, %v313_v62  ;;  %v374_v32 = vmul.f32 1.442695, %v344_v22  ;;  %v265_v59 = vrot.slane %v1219_v37, %v1254_v63 }
 0x15e   :  { %911 = vpow2.f32 %v348_v61  ;;  %v340_v44 = vsub.f32 %v1144_v8, %v293_v25  ;;  %v350_v45 = vmul.f32 1.442695, %v332_v1  ;;  %v297_v11 = vrot.slane %v247_v43, %v1254_v63 }
 0x15f   :  { %913 = vpow2.f32 %v370_v13  ;;  %v376_v48 = vmul.f32 1.442695, %v345_v31  ;;  %v333_v8 = vsub.f32 %v1150_v15, %v265_v59  ;;  %v269_v54 = vrot.slane %v1219_v37, %v1222_v40 }
 0x160   :  { %915 = vpow2.f32 %v362_v21  ;;  %v366_v56 = vmul.f32 1.442695, %v340_v44  ;;  %v341_v53 = vsub.f32 %v1148_v14, %v297_v11  ;;  %v273_v60 = vrot.slane %v1219_v37, %v1229_v46 }
 0x161   :  { %917 = vpow2.f32 %v372_v27  ;;  %v352_v43 = vmul.f32 1.442695, %v333_v8  ;;  %v334_v61 = vsub.f32 %v1156_v20, %v269_v54  ;;  %v277_v12 = vrot.slane %v1219_v37, %v1239_v52 }
 0x162   :  { %919 = vpow2.f32 %v364_v28  ;;  %v368_v58 = vmul.f32 1.442695, %v341_v53  ;;  %v335_v13 = vsub.f32 %v1164_v26, %v273_v60  ;;  %v281_v20 = vrot.slane %v1219_v37, %v1246_v7 }
 0x163   :  { %921 = vpow2.f32 %v374_v32  ;;  %v354_v16 = vmul.f32 1.442695, %v334_v61  ;;  %v336_v62 = vsub.f32 %v1178_v39, %v277_v12 }
 0x164   :  { %923 = vpow2.f32 %v350_v45  ;;  %v356_v22 = vmul.f32 1.442695, %v335_v13  ;;  %v337_v26 = vsub.f32 %v1198_v57, %v281_v20 }
 0x165   :  { %925 = vpow2.f32 %v376_v48  ;;  %v358_v25 = vmul.f32 1.442695, %v336_v62 }
 0x166   :  { %927 = vpow2.f32 %v366_v56  ;;  %v360_v1 = vmul.f32 1.442695, %v337_v26 }
 0x167   :  { %v1263_v47 = vpop.eup %909  ;;  %929 = vpow2.f32 %v352_v43 }
 0x168   :  { %v1265_v38 = vpop.eup %911  ;;  %395 = vperm.xlu0 %907, %v1263_v47   ;;  %931 = vpow2.f32 %v368_v58 }
 0x169   :  { %398 = vperm.xlu1 %908, %v1265_v38   ;;  %v1271_v49 = vpop.eup %913  ;;  %933 = vpow2.f32 %v354_v16 }
 0x16a   :  { %v1273_v50 = vpop.eup %915  ;;  %935 = vpow2.f32 %v356_v22 }
 0x16b   :  { %v1280_v55 = vpop.eup %917  ;;  %937 = vpow2.f32 %v358_v25 }
 0x16c   :  { %431 = vperm.xlu0 %907, %v1271_v49   ;;  %v1282_v15 = vpop.eup %919  ;;  %939 = vpow2.f32 %v360_v1 }
 0x16d   :  { %419 = vperm.xlu1 %908, %v1273_v50   ;;  %v1289_v14 = vpop.eup %921 }
 0x16e   :  { %v1291_v3 = vpop.eup %923 }
 0x16f   :  { %v1298_v21 = vpop.eup %925 }
 0x170   :  { %434 = vperm.xlu0 %907, %v1280_v55   ;;  %v1300_v19 = vpop.eup %927 }
 0x171   :  { %422 = vperm.xlu1 %908, %v1282_v15   ;;  %v1307_v27 = vpop.eup %929 }
 0x172   :  { %v1311_v28 = vpop.eup %931 }
 0x173   :  { %v1314_v31 = vpop.eup %933 }
 0x174   :  { %437 = vperm.xlu0 %907, %v1289_v14   ;;  %v1317_v39 = vpop.eup %935 }
 0x175   :  { %401 = vperm.xlu1 %908, %v1291_v3   ;;  %v1320_v37 = vpop.eup %937 }
 0x176   :  { %v1323_v57 = vpop.eup %939 }
 0x178   :  { %440 = vperm.xlu0 %907, %v1298_v21  }
 0x179   :  { %425 = vperm.xlu1 %908, %v1300_v19  }
 0x17d   :  { %404 = vperm.xlu1 %908, %v1307_v27  }
 0x181   :  { %428 = vperm.xlu1 %908, %v1311_v28  }
 0x185   :  { %407 = vperm.xlu1 %908, %v1314_v31  }
 0x189   :  { %410 = vperm.xlu1 %908, %v1317_v39  }
 0x18d   :  { %413 = vperm.xlu1 %908, %v1320_v37  }
 0x191   :  { %416 = vperm.xlu1 %908, %v1323_v57  }
 0x1e7   :  { %v396_v44 = vpop.permute.xlu0 %395 }
 0x1e8   :  { %v399_v32 = vpop.permute.xlu1 %398 }
 0x1eb   :  { %v432_v45 = vpop.permute.xlu0 %431 }
 0x1ec   :  { %v420_v59 = vpop.permute.xlu1 %419  ;;  %v493_v16 = vrot.slane %v432_v45, %v1140_v4 }
 0x1ed   :  { %v477_v60 = vrot.slane %v420_v59, %v1140_v4 }
 0x1ef   :  { %v435_v56 = vpop.permute.xlu0 %434 }
 0x1f0   :  { %v423_v48 = vpop.permute.xlu1 %422  ;;  %v497_v22 = vrot.slane %v435_v56, %v1140_v4  ;;  %v449_v56 = vrot.slane %v399_v32, %v1140_v4 }
 0x1f1   :  { %v481_v43 = vrot.slane %v423_v48, %v1140_v4 }
 0x1f3   :  { %v438_v53 = vpop.permute.xlu0 %437  ;;  %v513_v12 = vsel %vm218_vm1, %v481_v43, %v477_v60 }
 0x1f4   :  { %v402_v11 = vpop.permute.xlu1 %401  ;;  %v501_v25 = vrot.slane %v438_v53, %v1140_v4 }
 0x1f5   :  { %v453_v53 = vrot.slane %v402_v11, %v1140_v4 }
 0x1f7   :  { %v441_v62 = vpop.permute.xlu0 %440 }
 0x1f8   :  { %v426_v8 = vpop.permute.xlu1 %425  ;;  %v505_v59 = vrot.slane %v441_v62, %v1140_v4 }
 0x1f9   :  { %v485_v58 = vrot.slane %v426_v8, %v1140_v4 }
 0x1fb   :  { %v514_v20 = vsel %vm220_vm2, %v485_v58, %v513_v12 }
 0x1fc   :  { %v405_v54 = vpop.permute.xlu1 %404 }
 0x1fd   :  { %v457_v12 = vrot.slane %v405_v54, %v1140_v4 }
 0x200   :  { %v429_v61 = vpop.permute.xlu1 %428 }
 0x201   :  { %v489_v13 = vrot.slane %v429_v61, %v1140_v4  ;;  %v445_v61 = vrot.slane %v396_v44, %v1140_v4 }
 0x203   :  { %v515_v26 = vsel %vm222_vm3, %v489_v13, %v514_v20  ;;  %v506_v20 = vsel %vm218_vm1, %v449_v56, %v445_v61 }
 0x204   :  { %v516_v1 = vsel %vm224_vm4, %v493_v16, %v515_v26  ;;  %v408_v48 = vpop.permute.xlu1 %407 }
 0x205   :  { %v517_v8 = vsel %vm226_vm5, %v497_v22, %v516_v1  ;;  %v461_v13 = vrot.slane %v408_v48, %v1140_v4  ;;  %v507_v22 = vsel %vm220_vm2, %v453_v53, %v506_v20 }
 0x206   :  { %v518_v43 = vsel %vm228_vm6, %v501_v25, %v517_v8  ;;  %v508_v32 = vsel %vm222_vm3, %v457_v12, %v507_v22 }
 0x207   :  { %v519_v45 = vsel %vm230_vm7, %v505_v59, %v518_v43  ;;  %v509_v44 = vsel %vm224_vm4, %v461_v13, %v508_v32 }
 0x208   :  { %v411_v60 = vpop.permute.xlu1 %410  ;;  %v525_v58 = vsel %vm241_vm8, %v519_v45, 0.0 }
 0x209   :  { %526 = vadd.xlane.f32.xlu0 %v525_v58  ;;  %v465_v62 = vrot.slane %v411_v60, %v1140_v4 }
 0x20b   :  { %v510_v11 = vsel %vm226_vm5, %v465_v62, %v509_v44 }
 0x20c   :  { %v414_v16 = vpop.permute.xlu1 %413 }
 0x20d   :  { %v469_v26 = vrot.slane %v414_v16, %v1140_v4 }
 0x20f   :  { %v511_v1 = vsel %vm228_vm6, %v469_v26, %v510_v11 }
 0x210   :  { %v417_v25 = vpop.permute.xlu1 %416 }
 0x211   :  { %v473_v54 = vrot.slane %v417_v25, %v1140_v4 }
 0x213   :  { %v512_v48 = vsel %vm230_vm7, %v473_v54, %v511_v1 }
 0x214   :  { %v522_v59 = vsel %vm241_vm8, %v512_v48, 0.0 }
 0x215   :  { %523 = vadd.xlane.f32.xlu1 %v522_v59 }
 0x296   :  { %v527_v8 = vpop.xlane.xlu0 %526 }
 0x297   :  { %v565_v58 = vrot.slane %v527_v8, %v1214_v33  ;;  %v569_v56 = vrot.slane %v527_v8, %v1217_v34  ;;  %v573_v61 = vrot.slane %v527_v8, %v1236_v51  ;;  %v577_v12 = vrot.slane %v527_v8, %v1254_v63 }
 0x298   :  { %v581_v20 = vrot.slane %v527_v8, %v1222_v40  ;;  %v585_v32 = vrot.slane %v527_v8, %v1229_v46  ;;  %v589_v11 = vrot.slane %v527_v8, %v1239_v52  ;;  %v593_v48 = vrot.slane %v527_v8, %v1246_v7 }
 0x2a2   :  { %v524_v43 = vpop.xlane.xlu1 %523 }
 0x2a3   :  { %v537_v45 = vrot.slane %v524_v43, %v1217_v34  ;;  %v533_v60 = vrot.slane %v524_v43, %v1214_v33  ;;  %v541_v4 = vrot.slane %v524_v43, %v1236_v51  ;;  %v545_v53 = vrot.slane %v524_v43, %v1254_v63 }
 0x2a4   :  { %v549_v33 = vrot.slane %v524_v43, %v1222_v40  ;;  %v553_v26 = vrot.slane %v524_v43, %v1229_v46  ;;  %v557_v40 = vrot.slane %v524_v43, %v1239_v52  ;;  %v561_v46 = vrot.slane %v524_v43, %v1246_v7 }
 0x2a5   :  { %941 = vrcp.f32 %v537_v45 }
 0x2a6   :  { %943 = vrcp.f32 %v533_v60 }
 0x2a7   :  { %945 = vrcp.f32 %v565_v58 }
 0x2a8   :  { %947 = vrcp.f32 %v569_v56 }
 0x2a9   :  { %949 = vrcp.f32 %v541_v4 }
 0x2aa   :  { %951 = vrcp.f32 %v573_v61 }
 0x2ab   :  { %953 = vrcp.f32 %v545_v53 }
 0x2ac   :  { %955 = vrcp.f32 %v577_v12 }
 0x2ad   :  { %957 = vrcp.f32 %v549_v33 }
 0x2ae   :  { %959 = vrcp.f32 %v581_v20 }
 0x2af   :  { %v942_v13 = vpop.eup %941  ;;  %961 = vrcp.f32 %v553_v26 }
 0x2b0   :  { %v944_v16 = vpop.eup %943  ;;  %v613_v34 = vmul.f32 %v942_v13, %v1265_v38  ;;  %963 = vrcp.f32 %v585_v32 }
 0x2b1   :  { %v946_v62 = vpop.eup %945  ;;  %v611_v22 = vmul.f32 %v944_v16, %v1263_v47  ;;  %965 = vrcp.f32 %v557_v40 }
 0x2b2   :  { %v948_v51 = vpop.eup %947  ;;  %649 = vperm.xlu1 %908, %v613_v34   ;;  %v627_v63 = vmul.f32 %v946_v62, %v1273_v50  ;;  %967 = vrcp.f32 %v589_v11 }
 0x2b3   :  { %644 = vperm.xlu0 %907, %v611_v22   ;;  %v950_v44 = vpop.eup %949  ;;  %v629_v38 = vmul.f32 %v948_v51, %v1282_v15  ;;  %969 = vrcp.f32 %v561_v46 }
 0x2b4   :  { %v952_v25 = vpop.eup %951  ;;  %v615_v47 = vmul.f32 %v950_v44, %v1291_v3  ;;  %971 = vrcp.f32 %v593_v48 }
 0x2b5   :  { %v954_v54 = vpop.eup %953  ;;  %v631_v50 = vmul.f32 %v952_v25, %v1300_v19 }
 0x2b6   :  { %684 = vperm.xlu1 %908, %v627_v63   ;;  %v956_v1 = vpop.eup %955  ;;  %v617_v15 = vmul.f32 %v954_v54, %v1307_v27 }
 0x2b7   :  { %689 = vperm.xlu0 %907, %v629_v38   ;;  %v958_v59 = vpop.eup %957  ;;  %v633_v3 = vmul.f32 %v956_v1, %v1311_v28 }
 0x2b8   :  { %v960_v45 = vpop.eup %959  ;;  %v619_v52 = vmul.f32 %v958_v59, %v1314_v31 }
 0x2b9   :  { %v962_v19 = vpop.eup %961  ;;  %v635_v60 = vmul.f32 %v960_v45, %v1271_v49 }
 0x2ba   :  { %654 = vperm.xlu1 %908, %v615_v47   ;;  %v964_v58 = vpop.eup %963  ;;  %v621_v27 = vmul.f32 %v962_v19, %v1317_v39 }
 0x2bb   :  { %694 = vperm.xlu0 %907, %v631_v50   ;;  %v966_v43 = vpop.eup %965  ;;  %v637_v7 = vmul.f32 %v964_v58, %v1280_v55 }
 0x2bc   :  { %v968_v8 = vpop.eup %967  ;;  %v623_v28 = vmul.f32 %v966_v43, %v1320_v37 }
 0x2bd   :  { %v970_v56 = vpop.eup %969  ;;  %v639_v31 = vmul.f32 %v968_v8, %v1289_v14 }
 0x2be   :  { %659 = vperm.xlu1 %908, %v617_v15   ;;  %v972_v4 = vpop.eup %971  ;;  %v625_v49 = vmul.f32 %v970_v56, %v1323_v57 }
 0x2bf   :  { %699 = vperm.xlu0 %907, %v633_v3   ;;  %v641_v61 = vmul.f32 %v972_v4, %v1298_v21 }
 0x2c2   :  { %664 = vperm.xlu1 %908, %v619_v52  }
 0x2c3   :  { %704 = vperm.xlu0 %907, %v635_v60  }
 0x2c6   :  { %669 = vperm.xlu1 %908, %v621_v27  }
 0x2c7   :  { %709 = vperm.xlu0 %907, %v637_v7  }
 0x2ca   :  { %674 = vperm.xlu1 %908, %v623_v28  }
 0x2cb   :  { %714 = vperm.xlu0 %907, %v639_v31  }
 0x2ce   :  { %679 = vperm.xlu1 %908, %v625_v49  }
 0x2cf   :  { %719 = vperm.xlu0 %907, %v641_v61  }
 0x331   :  { %v650_v39 = vpop.permute.xlu1 %649 }
 0x332   :  { %v723_v55 = vmul.f32 %v650_v39, %v1072_v6  ;;  %v645_v53 = vpop.permute.xlu0 %644 }
 0x333   :  { %v722_v12 = vmul.f32 %v645_v53, %v1066_v2 }
 0x334   :  { %v745_v37 = vsel %vm70_vm0, %v723_v55, 0.0 }
 0x335   :  { %v746_v13 = vrot.slane %v745_v37, 4  ;;  %v738_v14 = vsel %vm70_vm0, %v722_v12, 0.0  ;;  %v685_v33 = vpop.permute.xlu1 %684 }
 0x336   :  { %v739_v16 = vrot.slane %v738_v14, 4  ;;  %v730_v34 = vmul.f32 %v685_v33, %v1061_v0  ;;  %v690_v57 = vpop.permute.xlu0 %689 }
 0x337   :  { %v747_v20 = vadd.f32 %v746_v13, %v745_v37  ;;  %v731_v21 = vmul.f32 %v690_v57, %v1070_v5 }
 0x338   :  { %v740_v62 = vadd.f32 %v739_v16, %v738_v14  ;;  %v794_v22 = vsel %vm70_vm0, %v730_v34, 0.0 }
 0x339   :  { %v748_v6 = vrot.slane %v747_v20, 2  ;;  %v795_v51 = vrot.slane %v794_v22, 4  ;;  %v801_v2 = vsel %vm70_vm0, %v731_v21, 0.0  ;;  %v655_v26 = vpop.permute.xlu1 %654 }
 0x33a   :  { %v741_v63 = vrot.slane %v740_v62, 2  ;;  %v802_v32 = vrot.slane %v801_v2, 4  ;;  %v724_v44 = vmul.f32 %v655_v26, %v1078_v10  ;;  %v695_v38 = vpop.permute.xlu0 %694 }
 0x33b   :  { %v796_v25 = vadd.f32 %v795_v51, %v794_v22  ;;  %v732_v0 = vmul.f32 %v695_v38, %v1076_v9  ;;  %v749_v40 = vadd.f32 %v748_v6, %v747_v20 }
 0x33c   :  { %v742_v47 = vadd.f32 %v741_v63, %v740_v62  ;;  %v803_v11 = vadd.f32 %v802_v32, %v801_v2  ;;  %v752_v5 = vsel %vm70_vm0, %v724_v44, 0.0 }
 0x33d   :  { %v660_v54 = vpop.permute.xlu1 %659  ;;  %v797_v46 = vrot.slane %v796_v25, 2  ;;  %v808_v15 = vsel %vm70_vm0, %v732_v0, 0.0  ;;  %v753_v59 = vrot.slane %v752_v5, 4  ;;  %v750_v3 = vrot.slane %v749_v40, 1 }
 0x33e   :  { %v725_v50 = vmul.f32 %v660_v54, %v1088_v18  ;;  %v700_v1 = vpop.permute.xlu0 %699  ;;  %v743_v45 = vrot.slane %v742_v47, 1  ;;  %v804_v9 = vrot.slane %v803_v11, 2  ;;  %v809_v60 = vrot.slane %v808_v15, 4 }
 0x33f   :  { %v733_v48 = vmul.f32 %v700_v1, %v1086_v17  ;;  %v798_v18 = vadd.f32 %v797_v46, %v796_v25  ;;  %v754_v8 = vadd.f32 %v753_v59, %v752_v5  ;;  %v751_v17 = vadd.f32 %v750_v3, %v749_v40 }
 0x340   :  { %v759_v10 = vsel %vm70_vm0, %v725_v50, 0.0  ;;  %v744_v56 = vadd.f32 %v743_v45, %v742_v47  ;;  %v805_v31 = vadd.f32 %v804_v9, %v803_v11  ;;  %v810_v61 = vadd.f32 %v809_v60, %v808_v15 }
 0x341   :  { %v815_v52 = vsel %vm70_vm0, %v733_v48, 0.0  ;;  %v665_v19 = vpop.permute.xlu1 %664  ;;  %v760_v58 = vrot.slane %v759_v10, 4  ;;  %v799_v37 = vrot.slane %v798_v18, 1 }
 0x342   :  { %v816_v27 = vrot.slane %v815_v52, 4  ;;  %v705_v43 = vpop.permute.xlu0 %704  ;;  %v726_v7 = vmul.f32 %v665_v19, %v1096_v24  ;;  %v755_v24 = vrot.slane %v754_v8, 2  ;;  %v806_v34 = vrot.slane %v805_v31, 1 }
 0x343   :  { %v734_v28 = vmul.f32 %v705_v43, %v1094_v23  ;;  %v761_v39 = vadd.f32 %v760_v58, %v759_v10  ;;  %v1412_v23 = vsel %vm218_vm1, %v751_v17, %v744_v56  ;;  %v811_v62 = vrot.slane %v810_v61, 2 }
 0x344   :  { %v766_v4 = vsel %vm70_vm0, %v726_v7, 0.0  ;;  %v817_v55 = vadd.f32 %v816_v27, %v815_v52  ;;  %v800_v26 = vadd.f32 %v799_v37, %v798_v18  ;;  %v756_v44 = vadd.f32 %v755_v24, %v754_v8 }
 0x345   :  { %v670_v49 = vpop.permute.xlu1 %669  ;;  %v767_v53 = vrot.slane %v766_v4, 4  ;;  %v822_v13 = vsel %vm70_vm0, %v734_v28, 0.0  ;;  %v762_v22 = vrot.slane %v761_v39, 2  ;;  %v807_v40 = vadd.f32 %v806_v34, %v805_v31 }
 0x346   :  { %v710_v12 = vpop.permute.xlu0 %709  ;;  %v727_v14 = vmul.f32 %v670_v49, %v1104_v30  ;;  %v823_v16 = vrot.slane %v822_v13, 4  ;;  %v818_v6 = vrot.slane %v817_v55, 2  ;;  %v812_v54 = vadd.f32 %v811_v62, %v810_v61 }
 0x347   :  { %v768_v33 = vadd.f32 %v767_v53, %v766_v4  ;;  %v735_v20 = vmul.f32 %v710_v12, %v1102_v29  ;;  %v763_v50 = vadd.f32 %v762_v22, %v761_v39  ;;  %v757_v27 = vrot.slane %v756_v44, 1 }
 0x348   :  { %v773_v57 = vsel %vm70_vm0, %v727_v14, 0.0  ;;  %v824_v51 = vadd.f32 %v823_v16, %v822_v13  ;;  %v819_v1 = vadd.f32 %v818_v6, %v817_v55  ;;  %v813_v43 = vrot.slane %v812_v54, 1 }
 0x349   :  { %v675_v21 = vpop.permute.xlu1 %674  ;;  %v774_v63 = vrot.slane %v773_v57, 4  ;;  %v829_v30 = vsel %vm70_vm0, %v735_v20, 0.0  ;;  %v769_v38 = vrot.slane %v768_v33, 2  ;;  %v764_v8 = vrot.slane %v763_v50, 1 }
 0x34a   :  { %v715_v2 = vpop.permute.xlu0 %714  ;;  %v728_v32 = vmul.f32 %v675_v21, %v1112_v36  ;;  %v825_v25 = vrot.slane %v824_v51, 2  ;;  %v830_v0 = vrot.slane %v829_v30, 4  ;;  %v758_v12 = vadd.f32 %v757_v27, %v756_v44 }
 0x34b   :  { %v775_v47 = vadd.f32 %v774_v63, %v773_v57  ;;  %v736_v11 = vmul.f32 %v715_v2, %v1110_v35  ;;  %v770_v3 = vadd.f32 %v769_v38, %v768_v33  ;;  %v814_v14 = vadd.f32 %v813_v43, %v812_v54 }
 0x34c   :  { %v780_v29 = vsel %vm70_vm0, %v728_v32, 0.0  ;;  %v831_v46 = vadd.f32 %v830_v0, %v829_v30  ;;  %v826_v45 = vadd.f32 %v825_v25, %v824_v51  ;;  %v765_v24 = vadd.f32 %v764_v8, %v763_v50 }
 0x34d   :  { %v680_v5 = vpop.permute.xlu1 %679  ;;  %v776_v48 = vrot.slane %v775_v47, 2  ;;  %v781_v59 = vrot.slane %v780_v29, 4  ;;  %v836_v36 = vsel %vm70_vm0, %v736_v11, 0.0  ;;  %v771_v31 = vrot.slane %v770_v3, 1 }
 0x34e   :  { %v720_v15 = vpop.permute.xlu0 %719  ;;  %v729_v10 = vmul.f32 %v680_v5, %v1120_v42  ;;  %v832_v9 = vrot.slane %v831_v46, 2  ;;  %v837_v52 = vrot.slane %v836_v36, 4  ;;  %v820_v42 = vrot.slane %v819_v1, 1 }
 0x34f   :  { %v777_v19 = vadd.f32 %v776_v48, %v775_v47  ;;  %v782_v60 = vadd.f32 %v781_v59, %v780_v29  ;;  %v737_v58 = vmul.f32 %v720_v15, %v1118_v41  ;;  %v827_v61 = vrot.slane %v826_v45, 1 }
 0x350   :  { %v787_v35 = vsel %vm70_vm0, %v729_v10, 0.0  ;;  %v833_v18 = vadd.f32 %v832_v9, %v831_v46  ;;  %v838_v7 = vadd.f32 %v837_v52, %v836_v36  ;;  %v821_v34 = vadd.f32 %v820_v42, %v819_v1 }
 0x351   :  { %v783_v28 = vrot.slane %v782_v60, 2  ;;  %v788_v17 = vrot.slane %v787_v35, 4  ;;  %v843_v56 = vsel %vm70_vm0, %v737_v58, 0.0  ;;  %v778_v39 = vrot.slane %v777_v19, 1 }
 0x352   :  { %v839_v4 = vrot.slane %v838_v7, 2  ;;  %v844_v49 = vrot.slane %v843_v56, 4  ;;  %v834_v37 = vrot.slane %v833_v18, 1  ;;  %v772_v57 = vadd.f32 %v771_v31, %v770_v3 }
 0x353   :  { %v784_v55 = vadd.f32 %v783_v28, %v782_v60  ;;  %v789_v53 = vadd.f32 %v788_v17, %v787_v35  ;;  %v873_v62 = vsel %vm218_vm1, %v807_v40, %v800_v26  ;;  %v828_v22 = vadd.f32 %v827_v61, %v826_v45 }
 0x354   :  { %v840_v41 = vadd.f32 %v839_v4, %v838_v7  ;;  %v845_v13 = vadd.f32 %v844_v49, %v843_v56  ;;  %v779_v6 = vadd.f32 %v778_v39, %v777_v19  ;;  %v867_v2 = vsel %vm220_vm2, %v758_v12, %v1412_v23 }
 0x355   :  { %v785_v33 = vrot.slane %v784_v55, 1  ;;  %v790_v16 = vrot.slane %v789_v53, 2  ;;  %v835_v63 = vadd.f32 %v834_v37, %v833_v18  ;;  %v874_v44 = vsel %vm220_vm2, %v814_v14, %v873_v62 }
 0x356   :  { %v841_v20 = vrot.slane %v840_v41, 1  ;;  %v846_v21 = vrot.slane %v845_v13, 2  ;;  %v868_v38 = vsel %vm222_vm3, %v765_v24, %v867_v2  ;;  %v875_v47 = vsel %vm222_vm3, %v821_v34, %v874_v44 }
 0x357   :  { %v791_v51 = vadd.f32 %v790_v16, %v789_v53  ;;  %v786_v30 = vadd.f32 %v785_v33, %v784_v55  ;;  %v869_v29 = vsel %vm224_vm4, %v772_v57, %v868_v38  ;;  %v876_v40 = vsel %vm224_vm4, %v828_v22, %v875_v47 }
 0x358   :  { %v847_v32 = vadd.f32 %v846_v21, %v845_v13  ;;  %v842_v25 = vadd.f32 %v841_v20, %v840_v41  ;;  %v870_v23 = vsel %vm226_vm5, %v779_v6, %v869_v29  ;;  %v877_v50 = vsel %vm226_vm5, %v835_v63, %v876_v40 }
 0x359   :  { %v792_v0 = vrot.slane %v791_v51, 1  ;;  %v871_v54 = vsel %vm228_vm6, %v786_v30, %v870_v23 }
 0x35a   :  { %v848_v26 = vrot.slane %v847_v32, 1  ;;  %v878_v46 = vsel %vm228_vm6, %v842_v25, %v877_v50 }
 0x35b   :  { %v793_v11 = vadd.f32 %v792_v0, %v791_v51 }
 0x35c   :  { %v849_v5 = vadd.f32 %v848_v26, %v847_v32 }
 0x35d   :  { %v872_v1 = vsel %vm230_vm7, %v793_v11, %v871_v54 }
 0x35e   :  { %v879_v15 = vsel %vm230_vm7, %v849_v5, %v878_v46  ;;  %882 = vst.msk [vmem:[#allocation6] sm:$0xff] %vm70_vm0, %v872_v1 }
 0x35f   :  { %883 = vst.msk [vmem:[#allocation6 + $0x8] sm:$0xff] %vm70_vm0, %v879_v15 }
 0x360   :  { %1006 = shalt.err (!%p1003_p12)
}
 0x361   :  { %s1007_s5 = scalar_lea.hbm %s1459_s3, 256 }
 0x362   :  { %p1008_p13 = scmp.ne.s32.totalorder %s1459_s3, %s1007_s5  ;;  %p1011_p0 = scmp.lt.u32.totalorder %s1007_s5, %s1459_s3 }
 0x364   :  { %p1013_p1 = pnand %p1011_p0, %p1008_p13 }
 0x366   :  { %1016 = shalt.err (!%p1013_p1)
}
 0x367   :  { %895 = dma.vmem_to_hbm [thread:$0]  %s890_s28, 256, %s1459_s3, [#allocation5], %s1022_s22, %s1022_s22, %s1023_s23  }
 0x368   :  { %1019 = dma.done.wait [#allocation5], 256  }
 0x369   :  { %1020 = vsyncadd [#allocation5], 4294967040 }
 0x36a   :  { %899 = vsyncpa [#allocation4], 1 }
 0x36b   :  { %900 = vsyncpa [#allocation5], 1 }

</bundles_post_ra>
